<compile_context>
chip_gen: v7x
topology: tpu7x:2x2x1
jax: 0.10.0
libtpu: 0.0.40
codegen_flags: <defaults>
</compile_context>

<pallas_src>
import functools

import jax
import jax.numpy as jnp
from jax.experimental import pallas as pl
from jax.experimental.pallas import tpu as pltpu

HIDDEN = 512
VMEM_BUDGET = 40 << 20  # per-step tile budget; leaves headroom on v7x (64 MiB VMEM)


def _round_up(n, m):
    return ((n + m - 1) // m) * m


def _pick_act_dtype():
    """bf16 activation path on v6e/v7x (bf16 EUP/VPU); f32 on v5e and older."""
    try:
        kind = jax.devices()[0].device_kind.lower()
    except Exception:
        return jnp.float32
    return jnp.bfloat16 if ("v6" in kind or "v7" in kind) else jnp.float32


def _vmem_estimate(tb, in_feat, act_bytes):
    return (2 * tb * in_feat * 4              # x tile (f32), double-buffered
            + in_feat * HIDDEN * 2            # W1 (bf16), resident
            + 2 * HIDDEN * 4                  # b1 + W2 rows, resident
            + tb * HIDDEN * (4 + 2 * act_bytes)  # z (f32) + tanh/product slabs
            + 2 * tb * 4)                     # (1, tb) f32 output, buffered


def _choose_tb(B, in_feat, act_dtype, requested=None):
    tb = requested if requested is not None else (4096 if in_feat <= 256 else 2048)
    tb = max(128, (min(tb, _round_up(B, 128)) // 128) * 128)
    # Keep >= 2 grid steps when the batch spans more than one 128-row tile so
    # dimension_semantics=("parallel",) can split work across v7x's two TCs.
    if B > 128 and pl.cdiv(B, tb) < 2:
        tb = max(128, _round_up(pl.cdiv(B, 2), 128))
    # Respect the VMEM budget (matters for large in_feat / huge tiles).
    act_bytes = jnp.dtype(act_dtype).itemsize
    while tb > 128 and _vmem_estimate(tb, in_feat, act_bytes) > VMEM_BUDGET:
        tb = max(128, ((tb // 2) // 128) * 128)
    return int(tb)


def _net_kernel(x_ref, w1_ref, b1_ref, w2_ref, b2_ref, o_ref, *, act_dtype):
    # Layer 1 on the MXU: cast x to bf16 in-kernel (halves x HBM traffic vs a
    # wrapper-side cast pass); accumulate in f32. W1/b1 are pre-scaled by 0.5.
    z = jnp.dot(x_ref[...].astype(jnp.bfloat16), w1_ref[...],
                preferred_element_type=jnp.float32)
    z = z + b1_ref[...]                                   # (tb, 512) f32
    # Hidden activation: sigmoid folded into tanh (constants folded in wrapper).
    t = jnp.tanh(z.astype(act_dtype))                     # EUP, bf16 on v6e/v7x
    # Layer 2 (N=1): VPU multiply + XLU lane reduction; W2 pre-scaled by 0.25,
    # reduction accumulates in f32. (MXU route left as a measure-first option.)
    p = t * w2_ref[...]                                   # (tb, 512)
    y = jnp.sum(p, axis=-1, dtype=jnp.float32, keepdims=True)   # (tb, 1) f32
    # Lane-dense relayout BEFORE the final transcendental + store.
    y = jnp.reshape(y, (1, -1)) + b2_ref[0]               # (1, tb)
    o_ref[...] = 0.5 * jnp.tanh(y) + 0.5                  # final sigmoid, dense vst


@functools.partial(jax.jit, static_argnames=("tb", "act_dtype"))
def _net_forward_impl(x, w1, b1, w2, b2, *, tb, act_dtype):
    B, in_feat = x.shape
    # Fold the sigmoid affine constants into the parameters (tiny one-time pass).
    w1_h = (0.5 * w1).astype(jnp.bfloat16)                     # (in_feat, 512)
    b1_h = (0.5 * b1).reshape(1, HIDDEN).astype(jnp.float32)   # (1, 512)
    w2_q = (0.25 * w2).reshape(1, HIDDEN).astype(act_dtype)    # (1, 512)
    b2_f = (0.5 * b2.reshape(1) + 0.25 * jnp.sum(w2)).astype(jnp.float32)  # (1,)

    grid_len = pl.cdiv(B, tb)
    b_pad = grid_len * tb

    out = pl.pallas_call(
        functools.partial(_net_kernel, act_dtype=act_dtype),
        out_shape=jax.ShapeDtypeStruct((1, b_pad), jnp.float32),
        grid=(grid_len,),
        in_specs=[
            pl.BlockSpec((tb, in_feat), lambda i: (i, 0)),       # x: streamed f32
            pl.BlockSpec((in_feat, HIDDEN), lambda i: (0, 0)),   # W1: VMEM-resident
            pl.BlockSpec((1, HIDDEN), lambda i: (0, 0)),         # b1: VMEM-resident
            pl.BlockSpec((1, HIDDEN), lambda i: (0, 0)),         # W2 row: resident
            pl.BlockSpec(memory_space=pltpu.MemorySpace.SMEM),   # folded b2 scalar
        ],
        out_specs=pl.BlockSpec((1, tb), lambda i: (0, i)),       # lane-dense output
        compiler_params=pltpu.CompilerParams(
            dimension_semantics=("parallel",),
            vmem_limit_bytes=48 << 20,
        ),
    )(x, w1_h, b1_h, w2_q, b2_f)
    return out[0, :B].reshape(B, 1)


def net_forward(x, w1, b1, w2, b2, *, tb=None):
    """x: (B, in_feat) f32; w1: (in_feat, 512); b1: (512,); w2: (512, 1); b2: (1,)."""
    act_dtype = _pick_act_dtype()
    tb_ = _choose_tb(x.shape[0], x.shape[1], act_dtype, tb)
    return _net_forward_impl(x, w1, b1, w2, b2, tb=tb_, act_dtype=act_dtype)


def init_params(key, in_feat):
    """Deterministic init mimicking torch.nn.Linear (uniform +/- 1/sqrt(fan_in))."""
    k1, k2, k3, k4 = jax.random.split(key, 4)
    bound1 = 1.0 / jnp.sqrt(jnp.float32(in_feat))
    bound2 = 1.0 / jnp.sqrt(jnp.float32(HIDDEN))
    w1 = jax.random.uniform(k1, (in_feat, HIDDEN), jnp.float32, -bound1, bound1)
    b1 = jax.random.uniform(k2, (HIDDEN,), jnp.float32, -bound1, bound1)
    w2 = jax.random.uniform(k3, (HIDDEN, 1), jnp.float32, -bound2, bound2)
    b2 = jax.random.uniform(k4, (1,), jnp.float32, -bound2, bound2)
    return w1, b1, w2, b2


if __name__ == "__main__":
    key = jax.random.PRNGKey(0)
    k_x, k_p = jax.random.split(key)

    # B not a multiple of the tile -> exercises the partial last block + a
    # 2-step parallel grid.
    B, in_feat = 200, 32
    x = jax.random.normal(k_x, (B, in_feat), jnp.float32)
    w1, b1, w2, b2 = init_params(k_p, in_feat)

    out = net_forward(x, w1, b1, w2, b2, tb=128)
    out = jax.block_until_ready(out)
    assert out.shape == (B, 1)

    # Reference mirroring the kernel's quantization (bf16 matmul inputs, f32
    # accumulate, same activation dtype / folded constants).
    act_dtype = _pick_act_dtype()
    zh = jnp.dot(x.astype(jnp.bfloat16), (0.5 * w1).astype(jnp.bfloat16),
                 preferred_element_type=jnp.float32) + 0.5 * b1
    t = jnp.tanh(zh.astype(act_dtype))
    w2q = (0.25 * w2.reshape(-1)).astype(act_dtype)
    y = (jnp.sum((t * w2q).astype(jnp.float32), axis=-1, keepdims=True)
         + 0.5 * b2 + 0.25 * jnp.sum(w2))
    ref_matched = 0.5 * jnp.tanh(y) + 0.5
    assert jnp.allclose(out, ref_matched, atol=5e-3, rtol=5e-3), \
        float(jnp.max(jnp.abs(out - ref_matched)))

    # Looser sanity check against the pure-f32 reference (bf16 trades precision).
    ref_f32 = jax.nn.sigmoid(jax.nn.sigmoid(x @ w1 + b1) @ w2 + b2)
    assert jnp.allclose(out, ref_f32, atol=3e-2), \
        float(jnp.max(jnp.abs(out - ref_f32)))

    print("KERNEL_OK")
</pallas_src>

<mosaic_0001>
module attributes {stable_mosaic.version = 11 : i64} {
  func.func @_net_kernel(%arg0: i32, %arg1: memref<128x32xf32, #tpu.memory_space<vmem>>, %arg2: memref<32x512xbf16, #tpu.memory_space<vmem>>, %arg3: memref<1x512xf32, #tpu.memory_space<vmem>>, %arg4: memref<1x512xf32, #tpu.memory_space<vmem>>, %arg5: memref<1xf32, #tpu.memory_space<smem>>, %arg6: memref<1x128xf32, #tpu.memory_space<vmem>>) attributes {dimension_semantics = [#tpu.dimension_semantics<parallel>], iteration_bounds = array<i64: 2>, scalar_prefetch = 0 : i64, scratch_operands = 0 : i64, tpu.core_type = #tpu.core_type<tc>, window_params = [{transform_indices = @transform_0, window_bounds = array<i64: 128, 32>}, {pipeline_mode = #tpu.pipeline_mode<synchronous>, transform_indices = @transform_1, window_bounds = array<i64: 32, 512>}, {pipeline_mode = #tpu.pipeline_mode<synchronous>, transform_indices = @transform_2, window_bounds = array<i64: 1, 512>}, {pipeline_mode = #tpu.pipeline_mode<synchronous>, transform_indices = @transform_3, window_bounds = array<i64: 1, 512>}, {transform_indices = @transform_4, window_bounds = array<i64: 1>}, {transform_indices = @transform_5, window_bounds = array<i64: 1, 128>}]} {
    %c0 = arith.constant 0 : index
    %c0_0 = arith.constant 0 : index
    %0 = vector.load %arg1[%c0, %c0_0] : memref<128x32xf32, #tpu.memory_space<vmem>>, vector<128x32xf32>
    %1 = arith.truncf %0 : vector<128x32xf32> to vector<128x32xbf16>
    %c0_1 = arith.constant 0 : index
    %c0_2 = arith.constant 0 : index
    %2 = vector.load %arg2[%c0_1, %c0_2] : memref<32x512xbf16, #tpu.memory_space<vmem>>, vector<32x512xbf16>
    %cst = arith.constant dense<0.000000e+00> : vector<128x512xf32>
    %3 = tpu.matmul %1, %2, %cst {dimension_numbers = #tpu.dot_dimension_numbers<[1], [0], [0], [1], [0, 0, 1, 1], [], []>} : vector<128x32xbf16>, vector<32x512xbf16>, vector<128x512xf32> -> vector<128x512xf32>
    %c0_3 = arith.constant 0 : index
    %c0_4 = arith.constant 0 : index
    %4 = vector.load %arg3[%c0_3, %c0_4] : memref<1x512xf32, #tpu.memory_space<vmem>>, vector<1x512xf32>
    %5 = vector.broadcast %4 : vector<1x512xf32> to vector<128x512xf32>
    %6 = arith.addf %3, %5 : vector<128x512xf32>
    %7 = math.tanh %6 : vector<128x512xf32>
    %c0_5 = arith.constant 0 : index
    %c0_6 = arith.constant 0 : index
    %8 = vector.load %arg4[%c0_5, %c0_6] : memref<1x512xf32, #tpu.memory_space<vmem>>, vector<1x512xf32>
    %9 = vector.broadcast %8 : vector<1x512xf32> to vector<128x512xf32>
    %10 = arith.mulf %7, %9 : vector<128x512xf32>
    %cst_7 = arith.constant dense<0.000000e+00> : vector<128xf32>
    %11 = vector.multi_reduction <add>, %10, %cst_7 [1] : vector<128x512xf32> to vector<128xf32>
    %12 = vector.shape_cast %11 : vector<128xf32> to vector<128x1xf32>
    %13 = vector.shape_cast %12 : vector<128x1xf32> to vector<1x128xf32>
    %c0_8 = arith.constant 0 : index
    %14 = memref.load %arg5[%c0_8] : memref<1xf32, #tpu.memory_space<smem>>
    %15 = vector.broadcast %14 : f32 to vector<1x128xf32>
    %16 = arith.addf %13, %15 : vector<1x128xf32>
    %17 = math.tanh %16 : vector<1x128xf32>
    %cst_9 = arith.constant 5.000000e-01 : f32
    %18 = vector.broadcast %cst_9 : f32 to vector<1x128xf32>
    %19 = arith.mulf %18, %17 : vector<1x128xf32>
    %cst_10 = arith.constant 5.000000e-01 : f32
    %20 = vector.broadcast %cst_10 : f32 to vector<1x128xf32>
    %21 = arith.addf %19, %20 : vector<1x128xf32>
    %c0_11 = arith.constant 0 : index
    %c0_12 = arith.constant 0 : index
    %22 = vector.load %arg6[%c0_11, %c0_12] : memref<1x128xf32, #tpu.memory_space<vmem>>, vector<1x128xf32>
    tpu.vector_store %arg6[%c0_11, %c0_12], %21 {strides = array<i32>} : memref<1x128xf32, #tpu.memory_space<vmem>>, vector<1x128xf32>,
    return
  }
  func.func @transform_0(%arg0: i32) -> (i32, i32) {
    %c0_i32 = arith.constant 0 : i32
    %c0_i32_0 = arith.constant 0 : i32
    return %arg0, %c0_i32 : i32, i32
  }
  func.func @transform_1(%arg0: i32) -> (i32, i32) {
    %c0_i32 = arith.constant 0 : i32
    %c0_i32_0 = arith.constant 0 : i32
    %c0_i32_1 = arith.constant 0 : i32
    return %c0_i32, %c0_i32_0 : i32, i32
  }
  func.func @transform_2(%arg0: i32) -> (i32, i32) {
    %c0_i32 = arith.constant 0 : i32
    %c0_i32_0 = arith.constant 0 : i32
    %c0_i32_1 = arith.constant 0 : i32
    return %c0_i32, %c0_i32_0 : i32, i32
  }
  func.func @transform_3(%arg0: i32) -> (i32, i32) {
    %c0_i32 = arith.constant 0 : i32
    %c0_i32_0 = arith.constant 0 : i32
    %c0_i32_1 = arith.constant 0 : i32
    return %c0_i32, %c0_i32_0 : i32, i32
  }
  func.func @transform_4(%arg0: i32) -> i32 {
    %c0_i32 = arith.constant 0 : i32
    %c0_i32_0 = arith.constant 0 : i32
    return %c0_i32 : i32
  }
  func.func @transform_5(%arg0: i32) -> (i32, i32) {
    %c0_i32 = arith.constant 0 : i32
    %c0_i32_0 = arith.constant 0 : i32
    return %c0_i32, %arg0 : i32, i32
  }
}

</mosaic_0001>

<bundles_post_ra>
// kernel: _net_forward_impl.1
= control target key start
LH: loop header
LB: loop body
LE: loop exit
PB: predicated region body
PF: predicated region fallthrough
CT: control target
= control target key end

     0   :  { %s1318_s20 = smov 0   ;;  %s1630_s0 = inlined_call_operand.vmem [shape: f32[200,32], index: 0, kind: input, shape index: {}]   ;;  %s1631_s1 = inlined_call_operand.vmem [shape: bf16[32,512], index: 1, kind: input, shape index: {}]   ;;  %s1632_s2 = inlined_call_operand.vmem [shape: f32[1,512], index: 2, kind: input, shape index: {}]   ;;  %s1633_s3 = inlined_call_operand.vmem [shape: f32[1,512], index: 3, kind: input, shape index: {}]   ;;  %s1634_s4 = inlined_call_operand.<no memory space> [shape: f32[1], index: 4, kind: input, shape index: {}]   ;;  %s1635_s5 = inlined_call_operand.vmem [shape: f32[1,256], index: 5, kind: output, shape index: {}]  }
   0x1   :  { %10 = sst [smem:[#allocation2]] %s1634_s4 }
   0x2 LB: > { %s1324_s21 = sadd.s32 4294967295, %s1282_s20   ;;  %p1066_p0 = scmp.ge.s32.totalorder %s1282_s20, 1  ;;  %s1282_s20 = sphi %s1318_s20, %s16_s20  }
   0x3   : > { %p197_p1 = scmp.lt.s32.totalorder %s1282_s20, 3 }
   0x5   : > { %p198_p2 = pnand %p1066_p0, %p197_p1 }
   0x6   : > { %v1104_v0 = vld [vmem:[%s1631_s1 + $0x4] ss:$16 sps:$4 sm:$0xff] (!%p198_p2)   ;;  %s1067_s4 = sshll.u32 (!%p198_p2), %s1324_s21, 4  ;;  %v1106_v1 = vld [vmem:[%s1631_s1 + $0xc] ss:$16 sps:$4 sm:$0xff] (!%p198_p2)   ;;  %v1284_v2 = vmov (!%p198_p2), 0   ;;  %v279_v33 = vlaneseq (!%p198_p2) }
   0x7   : > { %201 = sbr.rel (%p198_p2) target bundleno = 481 (0x1e1), region = 40  ;;  %396 = vmatprep.mubr.bf16.mxu0 (!%p198_p2), %v1284_v2  ;;  %509 = vmatprep.mubr.bf16.mxu1 (!%p198_p2), %v1284_v2  ;;  %p232_p3 = scmp.lt.s32.totalorder (!%p198_p2), %s1067_s4, 24  ;;  %v1108_v3 = vld [vmem:[%s1631_s1] ss:$16 sps:$4 sm:$0xff] (!%p198_p2)   ;;  %v1109_v4 = vld [vmem:[%s1631_s1 + $0x8] ss:$16 sps:$4 sm:$0xff] (!%p198_p2)  }
   0x8   : > { %364 = vmatprep.subr.bf16.mxu0 (!%p198_p2), %v1104_v0  ;;  %477 = vmatprep.subr.bf16.mxu1 (!%p198_p2), %v1106_v1  ;;  %v1110_v5 = vld [vmem:[%s1631_s1 + $0x24] ss:$16 sps:$4 sm:$0xff] (!%p198_p2)   ;;  %v1112_v6 = vld [vmem:[%s1631_s1 + $0x2c] ss:$16 sps:$4 sm:$0xff] (!%p198_p2)   ;;  %v1114_v7 = vld [vmem:[%s1631_s1 + $0x20] ss:$16 sps:$4 sm:$0xff] (!%p198_p2)  }
   0x9   : > { %365 = vmatpush1.bf16.msra.mxu0 (!%p198_p2), %v1108_v3  ;;  %478 = vmatpush1.bf16.msra.mxu1 (!%p198_p2), %v1109_v4  ;;  %v1115_v8 = vld [vmem:[%s1631_s1 + $0x28] ss:$16 sps:$4 sm:$0xff] (!%p198_p2)   ;;  %vm339_vm0 = vcmask (!%p198_p2), 261120   ;;  %v1407_v34 = vshrl.u32 (!%p198_p2), %v279_v33, 7  ;;  %v277_v37 = vld [vmem:[%s1632_s2] sm:$0xf] (!%p198_p2) }
   0xa   : > { %366 = vmatprep.subr.bf16.mxu0 (!%p198_p2), %v1110_v5  ;;  %479 = vmatprep.subr.bf16.mxu1 (!%p198_p2), %v1112_v6  ;;  %v654_v60 = vld [vmem:[%s1633_s3] sm:$0xf] (!%p198_p2)  ;;  %s820_s23 = sld [smem:[#allocation2]] (!%p198_p2)  ;;  %vm913_vm1 = vcmask (!%p198_p2), 130112   ;;  %vm920_vm2 = vcmask (!%p198_p2), 195712   ;;  %vm927_vm3 = vcmask (!%p198_p2), 261312  }
   0xb   : > { %v281_v35 = vsub.s32 (!%p198_p2), 0, %v1407_v34  ;;  %v289_v36 = vsub.s32 (!%p198_p2), 2, %v1407_v34  ;;  %v285_v38 = vsub.s32 (!%p198_p2), 1, %v1407_v34  ;;  %v293_v39 = vsub.s32 (!%p198_p2), 3, %v1407_v34  ;;  %p241_p4 = scmp.lt.s32.totalorder (!%p198_p2), %s1324_s21, 1 }
   0xc   : > { %vm934_vm4 = vcmask (!%p198_p2), 326912   ;;  %vm941_vm5 = vcmask (!%p198_p2), 392512   ;;  %vm948_vm6 = vcmask (!%p198_p2), 458112   ;;  %vm955_vm7 = vcmask (!%p198_p2), 523712  }
   0xd   : > { %367 = vmatpush1.bf16.msra.mxu0 (!%p198_p2), %v1114_v7  ;;  %480 = vmatpush1.bf16.msra.mxu1 (!%p198_p2), %v1115_v8  ;;  %v1416_v40 = vrot.slane (!%p198_p2), %v277_v37, %v281_v35  ;;  %v1418_v41 = vrot.slane (!%p198_p2), %v277_v37, %v289_v36  ;;  %v1420_v42 = vrot.slane (!%p198_p2), %v277_v37, %v285_v38  ;;  %vm962_vm8 = vcmask (!%p198_p2), 589312  }
   0xe   : > { %s1637_s4 = smov (!%p232_p3, %s1067_s4), 24  ;;  %v1422_v43 = vrot.slane %v277_v37, %v293_v39  ;;  %v1437_v3 = vrot.slane %v654_v60, %v281_v35  ;;  %vm969_vm9 = vcmask 654912   ;;  %vm976_vm10 = vcmask 720512   ;;  %s1639_s21 = smov (!%p241_p4, %s1324_s21), 1 }
   0xf   : > { %s1068_s13 = sshll.u32 %s1637_s4, 3  ;;  %vm983_vm11 = vcmask 786112   ;;  %vm990_vm12 = vcmask 851712   ;;  %vm997_vm13 = vcmask 917312   ;;  %vm1004_vm14 = vcmask 982912   ;;  %s243_s25 = scalar_lea.vmem %s1635_s5, %s1639_s21 }
  0x10   : > { %s1358_s16 = scalar_lea.vmem %s1630_s0, %s1068_s13  ;;  %vm1011_vm15 = vcmask 1048512  }
  0x11   : > { %v245_v9 = vld [vmem:[%s1358_s16] sm:$0xff]  ;;  %v246_v10 = vld [vmem:[%s1358_s16 + $0x8] sm:$0xff]  ;;  %v247_v12 = vld [vmem:[%s1358_s16 + $0x10] sm:$0xff] }
  0x12   : > { %v261_v11 = vpack.c.bf16 %v246_v10, %v245_v9  ;;  %v248_v13 = vld [vmem:[%s1358_s16 + $0x18] sm:$0xff]  ;;  %v249_v15 = vld [vmem:[%s1358_s16 + $0x20] sm:$0xff]  ;;  %v250_v16 = vld [vmem:[%s1358_s16 + $0x28] sm:$0xff] }
  0x13   : > { %v262_v14 = vpack.c.bf16 %v248_v13, %v247_v12  ;;  %v263_v17 = vpack.c.bf16 %v250_v16, %v249_v15  ;;  %v251_v18 = vld [vmem:[%s1358_s16 + $0x30] sm:$0xff]  ;;  %v252_v19 = vld [vmem:[%s1358_s16 + $0x38] sm:$0xff]  ;;  %v253_v21 = vld [vmem:[%s1358_s16 + $0x40] sm:$0xff]  ;;  %v1445_v13 = vrot.slane %v654_v60, %v289_v36 }
  0x14   : > { %1077 = vmatmul.mubr.msk.bf16.vlgmr.msra.gmra.mrb[0].mxu0 %vm339_vm0, %v261_v11  ;;  %1085 = vmatmul.mubr.msk.bf16.vlgmr.msra.gmra.mrb[0].mxu1 %vm339_vm0, %v261_v11  ;;  %v264_v20 = vpack.c.bf16 %v252_v19, %v251_v18  ;;  %v254_v22 = vld [vmem:[%s1358_s16 + $0x48] sm:$0xff]  ;;  %v255_v24 = vld [vmem:[%s1358_s16 + $0x50] sm:$0xff]  ;;  %v256_v25 = vld [vmem:[%s1358_s16 + $0x58] sm:$0xff]  ;;  %v1442_v11 = vrot.slane %v654_v60, %v285_v38 }
  0x15   : > { %406 = vmatprep.mubr.bf16.mxu0 %v1284_v2  ;;  %519 = vmatprep.mubr.bf16.mxu1 %v1284_v2  ;;  %v265_v23 = vpack.c.bf16 %v254_v22, %v253_v21  ;;  %v266_v26 = vpack.c.bf16 %v256_v25, %v255_v24  ;;  %v257_v27 = vld [vmem:[%s1358_s16 + $0x60] sm:$0xff]  ;;  %v258_v28 = vld [vmem:[%s1358_s16 + $0x68] sm:$0xff]  ;;  %v259_v30 = vld [vmem:[%s1358_s16 + $0x70] sm:$0xff] }
  0x16   : > { %v267_v29 = vpack.c.bf16 %v258_v28, %v257_v27  ;;  %v260_v31 = vld [vmem:[%s1358_s16 + $0x78] sm:$0xff] }
  0x17   : > { %v268_v32 = vpack.c.bf16 %v260_v31, %v259_v30 }
  0x1c   : > { %1078 = vmatmul.mubr.msk.bf16.gmra.mrb[4].mxu0 %vm339_vm0, %v262_v14  ;;  %1086 = vmatmul.mubr.msk.bf16.gmra.mrb[4].mxu1 %vm339_vm0, %v262_v14 }
  0x1d   : > { %416 = vmatprep.mubr.bf16.mxu0 %v1284_v2  ;;  %529 = vmatprep.mubr.bf16.mxu1 %v1284_v2 }
  0x24   : > { %1079 = vmatmul.mubr.msk.bf16.gmra.mrb[8].mxu0 %vm339_vm0, %v263_v17  ;;  %1087 = vmatmul.mubr.msk.bf16.gmra.mrb[8].mxu1 %vm339_vm0, %v263_v17 }
  0x25   : > { %426 = vmatprep.mubr.bf16.mxu0 %v1284_v2  ;;  %539 = vmatprep.mubr.bf16.mxu1 %v1284_v2 }
  0x2c   : > { %1080 = vmatmul.mubr.msk.bf16.gmra.mrb[12].mxu0 %vm339_vm0, %v264_v20  ;;  %1088 = vmatmul.mubr.msk.bf16.gmra.mrb[12].mxu1 %vm339_vm0, %v264_v20 }
  0x2d   : > { %436 = vmatprep.mubr.bf16.mxu0 %v1284_v2  ;;  %549 = vmatprep.mubr.bf16.mxu1 %v1284_v2 }
  0x34   : > { %1081 = vmatmul.mubr.msk.bf16.gmra.mrb[16].mxu0 %vm339_vm0, %v265_v23  ;;  %1089 = vmatmul.mubr.msk.bf16.gmra.mrb[16].mxu1 %vm339_vm0, %v265_v23  ;;  %v1450_v23 = vrot.slane %v654_v60, %v293_v39 }
  0x35   : > { %446 = vmatprep.mubr.bf16.mxu0 %v1284_v2  ;;  %559 = vmatprep.mubr.bf16.mxu1 %v1284_v2 }
  0x3c   : > { %1082 = vmatmul.mubr.msk.bf16.gmra.mrb[20].mxu0 %vm339_vm0, %v266_v26  ;;  %1090 = vmatmul.mubr.msk.bf16.gmra.mrb[20].mxu1 %vm339_vm0, %v266_v26 }
  0x3d   : > { %456 = vmatprep.mubr.bf16.mxu0 %v1284_v2  ;;  %569 = vmatprep.mubr.bf16.mxu1 %v1284_v2 }
  0x44   : > { %1083 = vmatmul.mubr.msk.bf16.gmra.mrb[24].mxu0 %vm339_vm0, %v267_v29  ;;  %1091 = vmatmul.mubr.msk.bf16.gmra.mrb[24].mxu1 %vm339_vm0, %v267_v29 }
  0x45   : > { %466 = vmatprep.mubr.bf16.mxu0 %v1284_v2  ;;  %579 = vmatprep.mubr.bf16.mxu1 %v1284_v2 }
  0x4c   : > { %1084 = vmatmul.mubr.msk.bf16.gmra.mrb[28].mxu0 %vm339_vm0, %v268_v32  ;;  %1092 = vmatmul.mubr.msk.bf16.gmra.mrb[28].mxu1 %vm339_vm0, %v268_v32 }
  0xe7   : > { %v398_v44 = vpop.f32.mrb[0].mxu0  ;;  %v511_v45 = vpop.f32.mrb[0].mxu1 }
  0xe8   : > { %v399_v46 = vadd.f32 %v398_v44, %v1416_v40  ;;  %v512_v47 = vadd.f32 %v511_v45, %v1418_v41  ;;  %v400_v48 = vpop.f32.mrb[1].mxu0  ;;  %v513_v49 = vpop.f32.mrb[1].mxu1 }
  0xe9   : > { %v401_v50 = vadd.f32 %v400_v48, %v1420_v42  ;;  %v514_v51 = vadd.f32 %v513_v49, %v1422_v43  ;;  %v402_v52 = vpop.f32.mrb[2].mxu0  ;;  %v515_v53 = vpop.f32.mrb[2].mxu1 }
  0xea   : > { %1116 = vtanh.f32 %v399_v46  ;;  %v403_v54 = vadd.f32 %v402_v52, %v1416_v40  ;;  %v404_v55 = vpop.f32.mrb[3].mxu0  ;;  %v517_v56 = vpop.f32.mrb[3].mxu1  ;;  %v516_v57 = vadd.f32 %v515_v53, %v1418_v41 }
  0xeb   : > { %1118 = vtanh.f32 %v512_v47  ;;  %v405_v58 = vadd.f32 %v404_v55, %v1420_v42  ;;  %v518_v59 = vadd.f32 %v517_v56, %v1422_v43 }
  0xec   : > { %1120 = vtanh.f32 %v401_v50 }
  0xed   : > { %1122 = vtanh.f32 %v514_v51 }
  0xee   : > { %1124 = vtanh.f32 %v403_v54 }
  0xef   : > { %1126 = vtanh.f32 %v516_v57  ;;  %v408_v61 = vpop.f32.mrb[4].mxu0  ;;  %v521_v62 = vpop.f32.mrb[4].mxu1 }
  0xf0   : > { %1128 = vtanh.f32 %v405_v58  ;;  %v409_v63 = vadd.f32 %v408_v61, %v1416_v40  ;;  %v522_v0 = vadd.f32 %v521_v62, %v1418_v41  ;;  %v410_v1 = vpop.f32.mrb[5].mxu0  ;;  %v523_v2 = vpop.f32.mrb[5].mxu1 }
  0xf1   : > { %1130 = vtanh.f32 %v518_v59  ;;  %v411_v4 = vadd.f32 %v410_v1, %v1420_v42  ;;  %v524_v5 = vadd.f32 %v523_v2, %v1422_v43  ;;  %v412_v6 = vpop.f32.mrb[6].mxu0  ;;  %v525_v7 = vpop.f32.mrb[6].mxu1 }
  0xf2   : > { %1132 = vtanh.f32 %v409_v63  ;;  %v413_v8 = vadd.f32 %v412_v6, %v1416_v40  ;;  %v414_v9 = vpop.f32.mrb[7].mxu0  ;;  %v527_v10 = vpop.f32.mrb[7].mxu1  ;;  %v526_v12 = vadd.f32 %v525_v7, %v1418_v41 }
  0xf3   : > { %1134 = vtanh.f32 %v522_v0  ;;  %v415_v15 = vadd.f32 %v414_v9, %v1420_v42  ;;  %v528_v17 = vadd.f32 %v527_v10, %v1422_v43 }
  0xf4   : > { %v1117_v14 = vpop.eup %1116  ;;  %1136 = vtanh.f32 %v411_v4 }
  0xf5   : > { %v1119_v16 = vpop.eup %1118  ;;  %1138 = vtanh.f32 %v524_v5  ;;  %v676_v18 = vmul.f32 %v1117_v14, %v1437_v3 }
  0xf6   : > { %v1121_v19 = vpop.eup %1120  ;;  %1140 = vtanh.f32 %v413_v8  ;;  %v678_v25 = vmul.f32 %v1119_v16, %v1445_v13 }
  0xf7   : > { %v1123_v20 = vpop.eup %1122  ;;  %1142 = vtanh.f32 %v526_v12  ;;  %v418_v21 = vpop.f32.mrb[8].mxu0  ;;  %v677_v24 = vmul.f32 %v1121_v19, %v1442_v11 }
  0xf8   : > { %v531_v22 = vpop.f32.mrb[8].mxu1  ;;  %v1125_v26 = vpop.eup %1124  ;;  %1144 = vtanh.f32 %v415_v15  ;;  %v419_v27 = vadd.f32 %v418_v21, %v1416_v40  ;;  %v679_v50 = vmul.f32 %v1123_v20, %v1450_v23 }
  0xf9   : > { %v532_v28 = vadd.f32 %v531_v22, %v1418_v41  ;;  %v420_v29 = vpop.f32.mrb[9].mxu0  ;;  %v533_v30 = vpop.f32.mrb[9].mxu1  ;;  %1146 = vtanh.f32 %v528_v17  ;;  %v740_v38 = vadd.f32 %v677_v24, %v676_v18  ;;  %v680_v47 = vmul.f32 %v1125_v26, %v1437_v3 }
  0xfa   : > { %v1127_v31 = vpop.eup %1126  ;;  %v421_v32 = vadd.f32 %v420_v29, %v1420_v42  ;;  %v534_v35 = vadd.f32 %v533_v30, %v1422_v43  ;;  %v422_v36 = vpop.f32.mrb[10].mxu0  ;;  %1148 = vtanh.f32 %v419_v27 }
  0xfb   : > { %v535_v37 = vpop.f32.mrb[10].mxu1  ;;  %v1129_v39 = vpop.eup %1128  ;;  %v423_v44 = vadd.f32 %v422_v36, %v1416_v40  ;;  %1150 = vtanh.f32 %v532_v28  ;;  %v741_v51 = vadd.f32 %v740_v38, %v678_v25  ;;  %v682_v59 = vmul.f32 %v1127_v31, %v1445_v13 }
  0xfc   : > { %v424_v45 = vpop.f32.mrb[11].mxu0  ;;  %v537_v46 = vpop.f32.mrb[11].mxu1  ;;  %v536_v49 = vadd.f32 %v535_v37, %v1418_v41  ;;  %1152 = vtanh.f32 %v421_v32  ;;  %v681_v54 = vmul.f32 %v1129_v39, %v1442_v11 }
  0xfd   : > { %v1131_v48 = vpop.eup %1130  ;;  %v425_v53 = vadd.f32 %v424_v45, %v1420_v42  ;;  %1154 = vtanh.f32 %v534_v35  ;;  %v538_v56 = vadd.f32 %v537_v46, %v1422_v43  ;;  %v742_v57 = vadd.f32 %v741_v51, %v679_v50 }
  0xfe   : > { %v1133_v52 = vpop.eup %1132  ;;  %1156 = vtanh.f32 %v423_v44  ;;  %v745_v60 = vadd.f32 %v681_v54, %v680_v47  ;;  %v683_v0 = vmul.f32 %v1131_v48, %v1450_v23 }
  0xff   : > { %v1135_v55 = vpop.eup %1134  ;;  %1158 = vtanh.f32 %v536_v49  ;;  %743 = vadd.xlane.f32.xlu0 %v742_v57  ;;  %v428_v62 = vpop.f32.mrb[12].mxu0  ;;  %v684_v1 = vmul.f32 %v1133_v52, %v1437_v3 }
 0x100   : > { %v1137_v58 = vpop.eup %1136  ;;  %v541_v63 = vpop.f32.mrb[12].mxu1  ;;  %1160 = vtanh.f32 %v425_v53  ;;  %v429_v5 = vadd.f32 %v428_v62, %v1416_v40  ;;  %v746_v9 = vadd.f32 %v745_v60, %v682_v59  ;;  %v686_v17 = vmul.f32 %v1135_v55, %v1445_v13 }
 0x101   : > { %v1139_v61 = vpop.eup %1138  ;;  %v685_v2 = vmul.f32 %v1137_v58, %v1442_v11  ;;  %v542_v6 = vadd.f32 %v541_v63, %v1418_v41  ;;  %v430_v7 = vpop.f32.mrb[13].mxu0  ;;  %1162 = vtanh.f32 %v538_v56 }
 0x102   : > { %v1141_v4 = vpop.eup %1140  ;;  %v543_v8 = vpop.f32.mrb[13].mxu1  ;;  %v431_v12 = vadd.f32 %v430_v7, %v1420_v42  ;;  %1164 = vtanh.f32 %v429_v5  ;;  %v747_v22 = vadd.f32 %v746_v9, %v683_v0  ;;  %v687_v35 = vmul.f32 %v1139_v61, %v1450_v23 }
 0x103   : > { %v1143_v10 = vpop.eup %1142  ;;  %v544_v14 = vadd.f32 %v543_v8, %v1422_v43  ;;  %v432_v15 = vpop.f32.mrb[14].mxu0  ;;  %1166 = vtanh.f32 %v542_v6  ;;  %v750_v26 = vadd.f32 %v685_v2, %v684_v1  ;;  %v688_v29 = vmul.f32 %v1141_v4, %v1437_v3 }
 0x104   : > { %v545_v16 = vpop.f32.mrb[14].mxu1  ;;  %v1145_v18 = vpop.eup %1144  ;;  %v433_v19 = vadd.f32 %v432_v15, %v1416_v40  ;;  %1168 = vtanh.f32 %v431_v12  ;;  %748 = vadd.xlane.f32.xlu0 %v747_v22  ;;  %v690_v38 = vmul.f32 %v1143_v10, %v1445_v13 }
 0x105   : > { %v434_v20 = vpop.f32.mrb[15].mxu0  ;;  %v547_v21 = vpop.f32.mrb[15].mxu1  ;;  %v546_v25 = vadd.f32 %v545_v16, %v1418_v41  ;;  %v689_v30 = vmul.f32 %v1145_v18, %v1442_v11  ;;  %1170 = vtanh.f32 %v544_v14  ;;  %v751_v36 = vadd.f32 %v750_v26, %v686_v17 }
 0x106   : > { %v1147_v24 = vpop.eup %1146  ;;  %v435_v28 = vadd.f32 %v434_v20, %v1420_v42  ;;  %v548_v32 = vadd.f32 %v547_v21, %v1422_v43  ;;  %1172 = vtanh.f32 %v433_v19 }
 0x107   : > { %v1149_v27 = vpop.eup %1148  ;;  %v691_v39 = vmul.f32 %v1147_v24, %v1450_v23  ;;  %v755_v44 = vadd.f32 %v689_v30, %v688_v29  ;;  %1174 = vtanh.f32 %v546_v25  ;;  %v752_v46 = vadd.f32 %v751_v36, %v687_v35  ;;  %v438_v47 = vpop.f32.mrb[16].mxu0 }
 0x108   : > { %v1151_v31 = vpop.eup %1150  ;;  %v551_v48 = vpop.f32.mrb[16].mxu1  ;;  %v692_v49 = vmul.f32 %v1149_v27, %v1437_v3  ;;  %1176 = vtanh.f32 %v435_v28  ;;  %v439_v52 = vadd.f32 %v438_v47, %v1416_v40 }
 0x109   : > { %v1153_v37 = vpop.eup %1152  ;;  %v552_v53 = vadd.f32 %v551_v48, %v1418_v41  ;;  %v440_v54 = vpop.f32.mrb[17].mxu0  ;;  %v756_v56 = vadd.f32 %v755_v44, %v690_v38  ;;  %1178 = vtanh.f32 %v548_v32  ;;  %753 = vadd.xlane.f32.xlu1 %v752_v46  ;;  %v694_v62 = vmul.f32 %v1151_v31, %v1445_v13 }
 0x10a   : > { %v1155_v45 = vpop.eup %1154  ;;  %v693_v50 = vmul.f32 %v1153_v37, %v1442_v11  ;;  %v553_v55 = vpop.f32.mrb[17].mxu1  ;;  %v441_v58 = vadd.f32 %v440_v54, %v1420_v42  ;;  %1180 = vtanh.f32 %v439_v52 }
 0x10b   : > { %v1157_v51 = vpop.eup %1156  ;;  %v554_v59 = vadd.f32 %v553_v55, %v1422_v43  ;;  %v442_v60 = vpop.f32.mrb[18].mxu0  ;;  %v757_v4 = vadd.f32 %v756_v56, %v691_v39  ;;  %1182 = vtanh.f32 %v552_v53  ;;  %v695_v16 = vmul.f32 %v1155_v45, %v1450_v23 }
 0x10c   : > { %v1159_v57 = vpop.eup %1158  ;;  %v555_v61 = vpop.f32.mrb[18].mxu1  ;;  %v443_v0 = vadd.f32 %v442_v60, %v1416_v40  ;;  %v760_v7 = vadd.f32 %v693_v50, %v692_v49  ;;  %1184 = vtanh.f32 %v441_v58  ;;  %v696_v10 = vmul.f32 %v1157_v51, %v1437_v3 }
 0x10d   : > { %v1161_v63 = vpop.eup %1160  ;;  %v444_v1 = vpop.f32.mrb[19].mxu0  ;;  %v556_v6 = vadd.f32 %v555_v61, %v1418_v41  ;;  %1186 = vtanh.f32 %v554_v59  ;;  %758 = vadd.xlane.f32.xlu1 %v757_v4  ;;  %v698_v19 = vmul.f32 %v1159_v57, %v1445_v13 }
 0x10e   : > { %v557_v2 = vpop.f32.mrb[19].mxu1  ;;  %v1163_v5 = vpop.eup %1162  ;;  %v445_v9 = vadd.f32 %v444_v1, %v1420_v42  ;;  %v697_v12 = vmul.f32 %v1161_v63, %v1442_v11  ;;  %v761_v17 = vadd.f32 %v760_v7, %v694_v62  ;;  %1188 = vtanh.f32 %v443_v0 }
 0x10f   : > { %v1165_v8 = vpop.eup %1164  ;;  %v558_v15 = vadd.f32 %v557_v2, %v1422_v43  ;;  %v699_v20 = vmul.f32 %v1163_v5, %v1450_v23  ;;  %1190 = vtanh.f32 %v556_v6  ;;  %v448_v25 = vpop.f32.mrb[20].mxu0 }
 0x110   : > { %v1167_v14 = vpop.eup %1166  ;;  %v765_v21 = vadd.f32 %v697_v12, %v696_v10  ;;  %v762_v24 = vadd.f32 %v761_v17, %v695_v16  ;;  %v561_v26 = vpop.f32.mrb[20].mxu1  ;;  %v700_v27 = vmul.f32 %v1165_v8, %v1437_v3  ;;  %1192 = vtanh.f32 %v445_v9 }
 0x111   : > { %v1169_v18 = vpop.eup %1168  ;;  %v449_v30 = vadd.f32 %v448_v25, %v1416_v40  ;;  %v562_v31 = vadd.f32 %v561_v26, %v1418_v41  ;;  %v450_v32 = vpop.f32.mrb[21].mxu0  ;;  %1194 = vtanh.f32 %v558_v15  ;;  %v702_v46 = vmul.f32 %v1167_v14, %v1445_v13 }
 0x112   : > { %v1171_v22 = vpop.eup %1170  ;;  %v701_v28 = vmul.f32 %v1169_v18, %v1442_v11  ;;  %v563_v35 = vpop.f32.mrb[21].mxu1  ;;  %v766_v36 = vadd.f32 %v765_v21, %v698_v19  ;;  %763 = vadd.xlane.f32.xlu0 %v762_v24  ;;  %v451_v38 = vadd.f32 %v450_v32, %v1420_v42 }
 0x113   : > { %v1173_v29 = vpop.eup %1172  ;;  %v564_v39 = vadd.f32 %v563_v35, %v1422_v43  ;;  %v452_v44 = vpop.f32.mrb[22].mxu0  ;;  %1196 = vtanh.f32 %v449_v30  ;;  %v703_v61 = vmul.f32 %v1171_v22, %v1450_v23 }
 0x114   : > { %v1175_v37 = vpop.eup %1174  ;;  %v565_v45 = vpop.f32.mrb[22].mxu1  ;;  %v767_v48 = vadd.f32 %v766_v36, %v699_v20  ;;  %v453_v49 = vadd.f32 %v452_v44, %v1416_v40  ;;  %1198 = vtanh.f32 %v562_v31  ;;  %v770_v54 = vadd.f32 %v701_v28, %v700_v27 }
 0x115   : > { %v1177_v47 = vpop.eup %1176  ;;  %v454_v50 = vpop.f32.mrb[23].mxu0  ;;  %v566_v53 = vadd.f32 %v565_v45, %v1418_v41  ;;  %1200 = vtanh.f32 %v451_v38  ;;  %v704_v57 = vmul.f32 %v1173_v29, %v1437_v3  ;;  %v706_v0 = vmul.f32 %v1175_v37, %v1445_v13 }
 0x116   : > { %v567_v51 = vpop.f32.mrb[23].mxu1  ;;  %v1179_v52 = vpop.eup %1178  ;;  %768 = vadd.xlane.f32.xlu1 %v767_v48  ;;  %v455_v56 = vadd.f32 %v454_v50, %v1420_v42  ;;  %v705_v58 = vmul.f32 %v1177_v47, %v1442_v11  ;;  %1202 = vtanh.f32 %v564_v39  ;;  %v771_v62 = vadd.f32 %v770_v54, %v702_v46 }
 0x117   : > { %v1181_v55 = vpop.eup %1180  ;;  %v568_v60 = vadd.f32 %v567_v51, %v1422_v43  ;;  %1204 = vtanh.f32 %v453_v49  ;;  %v707_v1 = vmul.f32 %v1179_v52, %v1450_v23  ;;  %v458_v6 = vpop.f32.mrb[24].mxu0 }
 0x118   : > { %v1183_v59 = vpop.eup %1182  ;;  %v775_v2 = vadd.f32 %v705_v58, %v704_v57  ;;  %1206 = vtanh.f32 %v566_v53  ;;  %v772_v5 = vadd.f32 %v771_v62, %v703_v61  ;;  %v571_v7 = vpop.f32.mrb[24].mxu1  ;;  %v708_v8 = vmul.f32 %v1181_v55, %v1437_v3 }
 0x119   : > { %v1185_v63 = vpop.eup %1184  ;;  %1208 = vtanh.f32 %v455_v56  ;;  %v459_v12 = vadd.f32 %v458_v6, %v1416_v40  ;;  %v572_v14 = vadd.f32 %v571_v7, %v1418_v41  ;;  %v460_v15 = vpop.f32.mrb[25].mxu0  ;;  %v710_v24 = vmul.f32 %v1183_v59, %v1445_v13 }
 0x11a   : > { %v1187_v4 = vpop.eup %1186  ;;  %v709_v9 = vmul.f32 %v1185_v63, %v1442_v11  ;;  %v573_v16 = vpop.f32.mrb[25].mxu1  ;;  %v776_v17 = vadd.f32 %v775_v2, %v706_v0  ;;  %1210 = vtanh.f32 %v568_v60  ;;  %773 = vadd.xlane.f32.xlu0 %v772_v5  ;;  %v461_v19 = vadd.f32 %v460_v15, %v1420_v42 }
 0x11b   : > { %v1189_v10 = vpop.eup %1188  ;;  %v574_v20 = vadd.f32 %v573_v16, %v1422_v43  ;;  %v462_v21 = vpop.f32.mrb[26].mxu0  ;;  %1212 = vtanh.f32 %v459_v12  ;;  %v711_v45 = vmul.f32 %v1187_v4, %v1450_v23 }
 0x11c   : > { %v1191_v18 = vpop.eup %1190  ;;  %v575_v22 = vpop.f32.mrb[26].mxu1  ;;  %v777_v26 = vadd.f32 %v776_v17, %v707_v1  ;;  %v463_v27 = vadd.f32 %v462_v21, %v1416_v40  ;;  %1214 = vtanh.f32 %v572_v14  ;;  %v780_v32 = vadd.f32 %v709_v9, %v708_v8 }
 0x11d   : > { %v1193_v25 = vpop.eup %1192  ;;  %v464_v28 = vpop.f32.mrb[27].mxu0  ;;  %v576_v31 = vadd.f32 %v575_v22, %v1418_v41  ;;  %1216 = vtanh.f32 %v461_v19  ;;  %v712_v37 = vmul.f32 %v1189_v10, %v1437_v3  ;;  %v714_v48 = vmul.f32 %v1191_v18, %v1445_v13 }
 0x11e   : > { %v577_v29 = vpop.f32.mrb[27].mxu1  ;;  %v1195_v30 = vpop.eup %1194  ;;  %778 = vadd.xlane.f32.xlu1 %v777_v26  ;;  %v465_v36 = vadd.f32 %v464_v28, %v1420_v42  ;;  %v713_v38 = vmul.f32 %v1193_v25, %v1442_v11  ;;  %1218 = vtanh.f32 %v574_v20  ;;  %v781_v46 = vadd.f32 %v780_v32, %v710_v24 }
 0x11f   : > { %v1197_v35 = vpop.eup %1196  ;;  %v578_v44 = vadd.f32 %v577_v29, %v1422_v43  ;;  %1220 = vtanh.f32 %v463_v27  ;;  %v715_v49 = vmul.f32 %v1195_v30, %v1450_v23  ;;  %v468_v53 = vpop.f32.mrb[28].mxu0 }
 0x120   : > { %v1199_v39 = vpop.eup %1198  ;;  %v785_v50 = vadd.f32 %v713_v38, %v712_v37  ;;  %1222 = vtanh.f32 %v576_v31  ;;  %v782_v52 = vadd.f32 %v781_v46, %v711_v45  ;;  %v581_v54 = vpop.f32.mrb[28].mxu1  ;;  %v716_v55 = vmul.f32 %v1197_v35, %v1437_v3 }
 0x121   : > { %v1201_v47 = vpop.eup %1200  ;;  %1224 = vtanh.f32 %v465_v36  ;;  %v469_v58 = vadd.f32 %v468_v53, %v1416_v40  ;;  %v582_v59 = vadd.f32 %v581_v54, %v1418_v41  ;;  %v470_v60 = vpop.f32.mrb[29].mxu0  ;;  %v718_v5 = vmul.f32 %v1199_v39, %v1445_v13 }
 0x122   : > { %v1203_v51 = vpop.eup %1202  ;;  %v717_v56 = vmul.f32 %v1201_v47, %v1442_v11  ;;  %v583_v61 = vpop.f32.mrb[29].mxu1  ;;  %v786_v62 = vadd.f32 %v785_v50, %v714_v48  ;;  %1226 = vtanh.f32 %v578_v44  ;;  %783 = vadd.xlane.f32.xlu0 %v782_v52  ;;  %v471_v0 = vadd.f32 %v470_v60, %v1420_v42 }
 0x123   : > { %v1205_v57 = vpop.eup %1204  ;;  %v584_v1 = vadd.f32 %v583_v61, %v1422_v43  ;;  %v472_v2 = vpop.f32.mrb[30].mxu0  ;;  %1228 = vtanh.f32 %v469_v58 }
 0x124   : > { %v1207_v63 = vpop.eup %1206  ;;  %v585_v4 = vpop.f32.mrb[30].mxu1  ;;  %v787_v7 = vadd.f32 %v786_v62, %v715_v49  ;;  %v473_v8 = vadd.f32 %v472_v2, %v1416_v40  ;;  %1230 = vtanh.f32 %v582_v59  ;;  %v790_v15 = vadd.f32 %v717_v56, %v716_v55 }
 0x125   : > { %v1209_v6 = vpop.eup %1208  ;;  %v474_v9 = vpop.f32.mrb[31].mxu0  ;;  %v586_v14 = vadd.f32 %v585_v4, %v1418_v41  ;;  %1232 = vtanh.f32 %v471_v0  ;;  %v720_v18 = vmul.f32 %v1205_v57, %v1437_v3  ;;  %v719_v40 = vmul.f32 %v1203_v51, %v1450_v23 }
 0x126   : > { %v587_v10 = vpop.f32.mrb[31].mxu1  ;;  %v1211_v12 = vpop.eup %1210  ;;  %788 = vadd.xlane.f32.xlu1 %v787_v7  ;;  %v475_v17 = vadd.f32 %v474_v9, %v1420_v42  ;;  %v721_v19 = vmul.f32 %v1209_v6, %v1442_v11  ;;  %1234 = vtanh.f32 %v584_v1  ;;  %v791_v21 = vadd.f32 %v790_v15, %v718_v5 }
 0x127   : > { %v1213_v16 = vpop.eup %1212  ;;  %1236 = vtanh.f32 %v473_v8  ;;  %v588_v41 = vadd.f32 %v587_v10, %v1422_v43  ;;  %v722_v25 = vmul.f32 %v1207_v63, %v1445_v13  ;;  %v723_v31 = vmul.f32 %v1211_v12, %v1450_v23 }
 0x128   : > { %v1215_v20 = vpop.eup %1214  ;;  %v724_v22 = vmul.f32 %v1213_v16, %v1437_v3  ;;  %v795_v26 = vadd.f32 %v721_v19, %v720_v18  ;;  %1238 = vtanh.f32 %v586_v14  ;;  %v792_v42 = vadd.f32 %v791_v21, %v719_v40 }
 0x129   : > { %v1217_v24 = vpop.eup %1216  ;;  %v726_v29 = vmul.f32 %v1215_v20, %v1445_v13  ;;  %1240 = vtanh.f32 %v475_v17  ;;  %v1563_v15 = vstv %s820_s23 }
 0x12a   : > { %v1219_v27 = vpop.eup %1218  ;;  %v725_v28 = vmul.f32 %v1217_v24, %v1442_v11  ;;  %v796_v32 = vadd.f32 %v795_v26, %v722_v25  ;;  %793 = vadd.xlane.f32.xlu0 %v792_v42  ;;  %1242 = vtanh.f32 %v588_v41 }
 0x12b   : > { %v1221_v30 = vpop.eup %1220  ;;  %v727_v44 = vmul.f32 %v1219_v27, %v1450_v23 }
 0x12c   : > { %v1223_v35 = vpop.eup %1222  ;;  %v800_v36 = vadd.f32 %v725_v28, %v724_v22  ;;  %v728_v43 = vmul.f32 %v1221_v30, %v1437_v3  ;;  %v797_v38 = vadd.f32 %v796_v32, %v723_v31  ;;  %v1575_v31 = vand.u32 127, %v279_v33 }
 0x12d   : > { %v1225_v37 = vpop.eup %1224  ;;  %v730_v50 = vmul.f32 %v1223_v35, %v1445_v13 }
 0x12e   : > { %v1227_v39 = vpop.eup %1226  ;;  %v801_v45 = vadd.f32 %v800_v36, %v726_v29  ;;  %v729_v46 = vmul.f32 %v1225_v37, %v1442_v11  ;;  %798 = vadd.xlane.f32.xlu1 %v797_v38  ;;  %v915_v38 = vadd.s32 4294967280, %v1575_v31 }
 0x12f   : > { %v1229_v47 = vpop.eup %1228  ;;  %v731_v55 = vmul.f32 %v1227_v39, %v1450_v23 }
 0x130   : > { %v1231_v48 = vpop.eup %1230  ;;  %v802_v49 = vadd.f32 %v801_v45, %v727_v44  ;;  %v805_v51 = vadd.f32 %v729_v46, %v728_v43  ;;  %v732_v52 = vmul.f32 %v1229_v47, %v1437_v3  ;;  %v908_v43 = vadd.s32 4294967288, %v1575_v31 }
 0x131   : > { %v1233_v53 = vpop.eup %1232  ;;  %v734_v58 = vmul.f32 %v1231_v48, %v1445_v13  ;;  %v922_v44 = vadd.s32 4294967272, %v1575_v31  ;;  %v929_v45 = vadd.s32 4294967264, %v1575_v31 }
 0x132   : > { %v1235_v54 = vpop.eup %1234  ;;  %803 = vadd.xlane.f32.xlu0 %v802_v49  ;;  %v806_v56 = vadd.f32 %v805_v51, %v730_v50  ;;  %v733_v57 = vmul.f32 %v1233_v53, %v1442_v11  ;;  %v906_v49 = vsub.s32 %v1575_v31, %v1407_v34 }
 0x133   : > { %v1237_v59 = vpop.eup %1236  ;;  %v735_v1 = vmul.f32 %v1235_v54, %v1450_v23 }
 0x134   : > { %v1239_v60 = vpop.eup %1238  ;;  %v807_v61 = vadd.f32 %v806_v56, %v731_v55  ;;  %v810_v62 = vadd.f32 %v733_v57, %v732_v52  ;;  %v736_v63 = vmul.f32 %v1237_v59, %v1437_v3  ;;  %v911_v52 = vsub.s32 %v908_v43, %v1407_v34 }
 0x135   : > { %v1241_v0 = vpop.eup %1240  ;;  %v738_v7 = vmul.f32 %v1239_v60, %v1445_v13  ;;  %v918_v56 = vsub.s32 %v915_v38, %v1407_v34 }
 0x136   : > { %808 = vadd.xlane.f32.xlu1 %v807_v61  ;;  %v811_v2 = vadd.f32 %v810_v62, %v734_v58  ;;  %v737_v4 = vmul.f32 %v1241_v0, %v1442_v11  ;;  %v1243_v5 = vpop.eup %1242  ;;  %v936_v58 = vadd.s32 4294967256, %v1575_v31  ;;  %v925_v61 = vsub.s32 %v922_v44, %v1407_v34 }
 0x137   : > { %v739_v9 = vmul.f32 %v1243_v5, %v1450_v23 }
 0x138   : > { %v812_v6 = vadd.f32 %v811_v2, %v735_v1  ;;  %v815_v8 = vadd.f32 %v737_v4, %v736_v63  ;;  %v932_v63 = vsub.s32 %v929_v45, %v1407_v34  ;;  %v943_v2 = vadd.s32 4294967248, %v1575_v31 }
 0x13a   : > { %813 = vadd.xlane.f32.xlu0 %v812_v6  ;;  %v816_v10 = vadd.f32 %v815_v8, %v738_v7 }
 0x13c   : > { %v817_v12 = vadd.f32 %v816_v10, %v739_v9 }
 0x13e   : > { %818 = vadd.xlane.f32.xlu1 %v817_v12  ;;  %v939_v12 = vsub.s32 %v936_v58, %v1407_v34 }
 0x18c   : > { %v744_v3 = vpop.xlane.xlu0 %743 }
 0x18d   : > { %v822_v17 = vadd.f32 %v1563_v15, %v744_v3  ;;  %v950_v3 = vadd.s32 4294967240, %v1575_v31 }
 0x18f   : > { %1244 = vtanh.f32 %v822_v17  ;;  %v957_v17 = vadd.s32 4294967232, %v1575_v31 }
 0x191   : > { %v749_v16 = vpop.xlane.xlu0 %748 }
 0x192   : > { %v823_v18 = vadd.f32 %v1563_v15, %v749_v16 }
 0x194   : > { %1246 = vtanh.f32 %v823_v18 }
 0x196   : > { %v754_v14 = vpop.xlane.xlu1 %753 }
 0x197   : > { %v824_v13 = vadd.f32 %v1563_v15, %v754_v14 }
 0x199   : > { %1248 = vtanh.f32 %v824_v13  ;;  %v1245_v42 = vpop.eup %1244 }
 0x19a   : > { %v759_v11 = vpop.xlane.xlu1 %758  ;;  %v854_v47 = vmul.f32 0.5, %v1245_v42 }
 0x19b   : > { %v825_v20 = vadd.f32 %v1563_v15, %v759_v11 }
 0x19c   : > { %v870_v60 = vadd.f32 0.5, %v854_v47 }
 0x19d   : > { %1250 = vtanh.f32 %v825_v20 }
 0x19e   : > { %v1247_v29 = vpop.eup %1246  ;;  %v907_v14 = vrot.slane %v870_v60, %v906_v49 }
 0x19f   : > { %v764_v19 = vpop.xlane.xlu0 %763  ;;  %v855_v37 = vmul.f32 0.5, %v1247_v29  ;;  %v971_v29 = vadd.s32 4294967216, %v1575_v31 }
 0x1a0   : > { %v826_v23 = vadd.f32 %v1563_v15, %v764_v19  ;;  %v946_v19 = vsub.s32 %v943_v2, %v1407_v34 }
 0x1a1   : > { %v871_v53 = vadd.f32 0.5, %v855_v37  ;;  %v974_v47 = vsub.s32 %v971_v29, %v1407_v34 }
 0x1a2   : > { %1252 = vtanh.f32 %v826_v23 }
 0x1a3   : > { %v769_v40 = vpop.xlane.xlu1 %768  ;;  %v1249_v30 = vpop.eup %1248  ;;  %v912_v6 = vrot.slane %v871_v53, %v911_v52 }
 0x1a4   : > { %v827_v22 = vadd.f32 %v1563_v15, %v769_v40  ;;  %v856_v39 = vmul.f32 0.5, %v1249_v30 }
 0x1a5   : > { %v914_v40 = vsel %vm913_vm1, %v912_v6, %v907_v14 }
 0x1a6   : > { %1254 = vtanh.f32 %v827_v22  ;;  %v872_v57 = vadd.f32 0.5, %v856_v39 }
 0x1a7   : > { %v774_v21 = vpop.xlane.xlu0 %773  ;;  %v1251_v35 = vpop.eup %1250 }
 0x1a8   : > { %v828_v24 = vadd.f32 %v1563_v15, %v774_v21  ;;  %v857_v33 = vmul.f32 0.5, %v1251_v35  ;;  %v919_v10 = vrot.slane %v872_v57, %v918_v56 }
 0x1aa   : > { %1256 = vtanh.f32 %v828_v24  ;;  %v873_v62 = vadd.f32 0.5, %v857_v33  ;;  %v978_v33 = vadd.s32 4294967208, %v1575_v31 }
 0x1ab   : > { %v779_v41 = vpop.xlane.xlu1 %778 }
 0x1ac   : > { %v829_v26 = vadd.f32 %v1563_v15, %v779_v41  ;;  %v1253_v36 = vpop.eup %1252  ;;  %v926_v16 = vrot.slane %v873_v62, %v925_v61  ;;  %v921_v41 = vsel %vm920_vm2, %v919_v10, %v914_v40  ;;  %v981_v60 = vsub.s32 %v978_v33, %v1407_v34 }
 0x1ad   : > { %v858_v50 = vmul.f32 0.5, %v1253_v36 }
 0x1ae   : > { %1258 = vtanh.f32 %v829_v26  ;;  %v964_v26 = vadd.s32 4294967224, %v1575_v31  ;;  %v928_v42 = vsel %vm927_vm3, %v926_v16, %v921_v41 }
 0x1af   : > { %v784_v25 = vpop.xlane.xlu0 %783  ;;  %v874_v0 = vadd.f32 0.5, %v858_v50 }
 0x1b0   : > { %v830_v27 = vadd.f32 %v1563_v15, %v784_v25  ;;  %v1255_v51 = vpop.eup %1254  ;;  %v953_v25 = vsub.s32 %v950_v3, %v1407_v34 }
 0x1b1   : > { %v859_v1 = vmul.f32 0.5, %v1255_v51  ;;  %v933_v11 = vrot.slane %v874_v0, %v932_v63  ;;  %v992_v0 = vadd.s32 4294967192, %v1575_v31 }
 0x1b2   : > { %1260 = vtanh.f32 %v830_v27 }
 0x1b3   : > { %v789_v28 = vpop.xlane.xlu1 %788  ;;  %v875_v18 = vadd.f32 0.5, %v859_v1  ;;  %v935_v30 = vsel %vm934_vm4, %v933_v11, %v928_v42  ;;  %v995_v10 = vsub.s32 %v992_v0, %v1407_v34 }
 0x1b4   : > { %v831_v32 = vadd.f32 %v1563_v15, %v789_v28  ;;  %v1257_v55 = vpop.eup %1256  ;;  %v960_v28 = vsub.s32 %v957_v17, %v1407_v34 }
 0x1b5   : > { %v860_v7 = vmul.f32 0.5, %v1257_v55 }
 0x1b6   : > { %1262 = vtanh.f32 %v831_v32  ;;  %v940_v32 = vrot.slane %v875_v18, %v939_v12  ;;  %v1006_v18 = vadd.s32 4294967176, %v1575_v31 }
 0x1b7   : > { %v794_v46 = vpop.xlane.xlu0 %793  ;;  %v876_v21 = vadd.f32 0.5, %v860_v7  ;;  %v999_v7 = vadd.s32 4294967184, %v1575_v31 }
 0x1b8   : > { %v832_v48 = vadd.f32 %v1563_v15, %v794_v46  ;;  %v1259_v5 = vpop.eup %1258  ;;  %v967_v46 = vsub.s32 %v964_v26, %v1407_v34  ;;  %v942_v49 = vsel %vm941_vm5, %v940_v32, %v935_v30 }
 0x1b9   : > { %v861_v13 = vmul.f32 0.5, %v1259_v5  ;;  %v947_v37 = vrot.slane %v876_v21, %v946_v19  ;;  %v1002_v17 = vsub.s32 %v999_v7, %v1407_v34 }
 0x1ba   : > { %1264 = vtanh.f32 %v832_v48  ;;  %v985_v48 = vadd.s32 4294967200, %v1575_v31 }
 0x1bb   : > { %v799_v54 = vpop.xlane.xlu1 %798  ;;  %v877_v35 = vadd.f32 0.5, %v861_v13  ;;  %v949_v55 = vsel %vm948_vm6, %v947_v37, %v942_v49 }
 0x1bc   : > { %v833_v59 = vadd.f32 %v1563_v15, %v799_v54  ;;  %v1261_v9 = vpop.eup %1260  ;;  %v988_v5 = vsub.s32 %v985_v48, %v1407_v34 }
 0x1bd   : > { %v862_v22 = vmul.f32 0.5, %v1261_v9  ;;  %v954_v50 = vrot.slane %v877_v35, %v953_v25 }
 0x1be   : > { %1266 = vtanh.f32 %v833_v59 }
 0x1bf   : > { %v804_v4 = vpop.xlane.xlu0 %803  ;;  %v878_v38 = vadd.f32 0.5, %v862_v22  ;;  %v956_v61 = vsel %vm955_vm7, %v954_v50, %v949_v55  ;;  %v1009_v22 = vsub.s32 %v1006_v18, %v1407_v34 }
 0x1c0   : > { %v834_v8 = vadd.f32 %v1563_v15, %v804_v4  ;;  %v1263_v23 = vpop.eup %1262 }
 0x1c1   : > { %v863_v36 = vmul.f32 0.5, %v1263_v23  ;;  %v961_v56 = vrot.slane %v878_v38, %v960_v28 }
 0x1c2   : > { %1268 = vtanh.f32 %v834_v8 }
 0x1c3   : > { %v809_v20 = vpop.xlane.xlu1 %808  ;;  %v879_v51 = vadd.f32 0.5, %v863_v36  ;;  %v963_v2 = vsel %vm962_vm8, %v961_v56, %v956_v61 }
 0x1c4   : > { %v835_v24 = vadd.f32 %v1563_v15, %v809_v20  ;;  %v1265_v27 = vpop.eup %1264 }
 0x1c5   : > { %v864_v39 = vmul.f32 0.5, %v1265_v27  ;;  %v968_v62 = vrot.slane %v879_v51, %v967_v46 }
 0x1c6   : > { %1270 = vtanh.f32 %v835_v24 }
 0x1c7   : > { %v814_v43 = vpop.xlane.xlu0 %813  ;;  %v880_v57 = vadd.f32 0.5, %v864_v39  ;;  %v970_v8 = vsel %vm969_vm9, %v968_v62, %v963_v2 }
 0x1c8   : > { %v836_v44 = vadd.f32 %v1563_v15, %v814_v43  ;;  %v1267_v45 = vpop.eup %1266 }
 0x1c9   : > { %v865_v52 = vmul.f32 0.5, %v1267_v45  ;;  %v975_v4 = vrot.slane %v880_v57, %v974_v47 }
 0x1ca   : > { %1272 = vtanh.f32 %v836_v44 }
 0x1cb   : > { %v819_v53 = vpop.xlane.xlu1 %818  ;;  %v881_v63 = vadd.f32 0.5, %v865_v52  ;;  %v977_v14 = vsel %vm976_vm10, %v975_v4, %v970_v8 }
 0x1cc   : > { %v1269_v54 = vpop.eup %1268  ;;  %v837_v58 = vadd.f32 %v1563_v15, %v819_v53 }
 0x1cd   : > { %v866_v59 = vmul.f32 0.5, %v1269_v54  ;;  %v982_v9 = vrot.slane %v881_v63, %v981_v60 }
 0x1ce   : > { %1274 = vtanh.f32 %v837_v58 }
 0x1cf   : > { %v882_v6 = vadd.f32 0.5, %v866_v59  ;;  %v984_v19 = vsel %vm983_vm11, %v982_v9, %v977_v14 }
 0x1d0   : > { %v1271_v1 = vpop.eup %1270 }
 0x1d1   : > { %v867_v15 = vmul.f32 0.5, %v1271_v1  ;;  %v989_v16 = vrot.slane %v882_v6, %v988_v5 }
 0x1d3   : > { %v883_v12 = vadd.f32 0.5, %v867_v15  ;;  %v991_v40 = vsel %vm990_vm12, %v989_v16, %v984_v19 }
 0x1d4   : > { %v1273_v3 = vpop.eup %1272 }
 0x1d5   : > { %v868_v11 = vmul.f32 0.5, %v1273_v3  ;;  %v996_v13 = vrot.slane %v883_v12, %v995_v10 }
 0x1d7   : > { %v884_v20 = vadd.f32 0.5, %v868_v11  ;;  %v998_v41 = vsel %vm997_vm13, %v996_v13, %v991_v40 }
 0x1d8   : > { %v1275_v23 = vpop.eup %1274 }
 0x1d9   : > { %v1003_v21 = vrot.slane %v884_v20, %v1002_v17  ;;  %v869_v24 = vmul.f32 0.5, %v1275_v23 }
 0x1db   : > { %v885_v25 = vadd.f32 0.5, %v869_v24  ;;  %v1005_v26 = vsel %vm1004_vm14, %v1003_v21, %v998_v41 }
 0x1dd   : > { %v1010_v31 = vrot.slane %v885_v25, %v1009_v22 }
 0x1df   : > { %v1012_v27 = vsel %vm1011_vm15, %v1010_v31, %v1005_v26 }
 0x1e0   : > { %1014 = vst [vmem:[%s243_s25] sm:$0x1] %v1012_v27 }
 0x1e1 PF: > { %s16_s20 = sadd.s32 1, %s1282_s20  }
 0x1e2   : > { %p13_p5 = scmp.ge.s32.totalorder %s16_s20, 4  }
 0x1e4   :  { %15 = sbr.rel (!%p13_p5) target bundleno = 2 (0x2), region = 70 }

</bundles_post_ra>
